<compile_context>
chip_gen: v5e
topology: v5e:2x2
jax: 0.10.0
libtpu: 0.0.40
codegen_flags: <defaults>
</compile_context>

<pallas_src>
import functools

import jax
import jax.numpy as jnp
from jax.experimental import pallas as pl
from jax.experimental.pallas import tpu as pltpu


# -----------------------------------------------------------------------------
# Kernel 1a: fused QKV projection (self-attention: one read of x per row tile).
# -----------------------------------------------------------------------------
def qkv_proj_kernel(x_ref, wqkv_ref, bqkv_ref, q_ref, k_ref, v_ref, *, scale):
    x = x_ref[0]                                              # (tm, D), native dtype
    q = jnp.dot(x, wqkv_ref[0], preferred_element_type=jnp.float32)
    k = jnp.dot(x, wqkv_ref[1], preferred_element_type=jnp.float32)
    v = jnp.dot(x, wqkv_ref[2], preferred_element_type=jnp.float32)
    q = (q + bqkv_ref[0].astype(jnp.float32)) * jnp.float32(scale)
    k = k + bqkv_ref[1].astype(jnp.float32)
    v = v + bqkv_ref[2].astype(jnp.float32)
    q_ref[0] = q.astype(q_ref.dtype)
    k_ref[0] = k.astype(k_ref.dtype)
    v_ref[0] = v.astype(v_ref.dtype)


def qkv_project(x, w_qkv, b_qkv, *, scale, row_tile=256):
    """x: (B, L, D); w_qkv: (3, D, D); b_qkv: (3, 1, D) -> (q, k, v) each (B, L, D)."""
    B, L, D = x.shape
    tm = min(row_tile, L)
    assert L % tm == 0, "sequence length must be a multiple of the row tile"

    row_spec = pl.BlockSpec((1, tm, D), lambda b, i: (b, i, 0))
    out_sds = jax.ShapeDtypeStruct((B, L, D), x.dtype)

    flops = int(3 * 2 * B * L * D * D)
    bytes_accessed = int(x.dtype.itemsize * x.size
                         + w_qkv.dtype.itemsize * w_qkv.size
                         + b_qkv.dtype.itemsize * b_qkv.size
                         + 3 * x.dtype.itemsize * B * L * D)

    return pl.pallas_call(
        functools.partial(qkv_proj_kernel, scale=scale),
        out_shape=(out_sds, out_sds, out_sds),
        grid_spec=pltpu.PrefetchScalarGridSpec(
            num_scalar_prefetch=0,
            grid=(B, L // tm),
            in_specs=[row_spec,
                      pl.BlockSpec((3, D, D), lambda b, i: (0, 0, 0)),
                      pl.BlockSpec((3, 1, D), lambda b, i: (0, 0, 0))],
            out_specs=(row_spec, row_spec, row_spec),
        ),
        compiler_params=pltpu.CompilerParams(
            dimension_semantics=("parallel", "parallel")),
        cost_estimate=pl.CostEstimate(flops=flops, transcendentals=0,
                                      bytes_accessed=bytes_accessed),
    )(x, w_qkv, b_qkv)


# -----------------------------------------------------------------------------
# Kernel 1b / 3: generic tiled linear  y = (x @ W + b) [* scale]
# -----------------------------------------------------------------------------
def linear_kernel(x_ref, w_ref, b_ref, o_ref, *, scale):
    acc = jnp.dot(x_ref[0], w_ref[...], preferred_element_type=jnp.float32)
    acc = acc + b_ref[...].astype(jnp.float32)
    if scale is not None:
        acc = acc * jnp.float32(scale)
    o_ref[0] = acc.astype(o_ref.dtype)


def linear(x, w, b, *, scale=None, row_tile=256):
    """x: (B, L, Din); w: (Din, Dout); b: (1, Dout) -> (B, L, Dout)."""
    B, L, Din = x.shape
    Dout = w.shape[1]
    tm = min(row_tile, L)
    assert L % tm == 0, "sequence length must be a multiple of the row tile"

    flops = int(2 * B * L * Din * Dout)
    bytes_accessed = int(x.dtype.itemsize * x.size
                         + w.dtype.itemsize * w.size
                         + b.dtype.itemsize * b.size
                         + x.dtype.itemsize * B * L * Dout)

    return pl.pallas_call(
        functools.partial(linear_kernel, scale=scale),
        out_shape=jax.ShapeDtypeStruct((B, L, Dout), x.dtype),
        grid_spec=pltpu.PrefetchScalarGridSpec(
            num_scalar_prefetch=0,
            grid=(B, L // tm),
            in_specs=[pl.BlockSpec((1, tm, Din), lambda b, i: (b, i, 0)),
                      pl.BlockSpec((Din, Dout), lambda b, i: (0, 0)),
                      pl.BlockSpec((1, Dout), lambda b, i: (0, 0))],
            out_specs=pl.BlockSpec((1, tm, Dout), lambda b, i: (b, i, 0)),
        ),
        compiler_params=pltpu.CompilerParams(
            dimension_semantics=("parallel", "parallel")),
        cost_estimate=pl.CostEstimate(flops=flops, transcendentals=0,
                                      bytes_accessed=bytes_accessed),
    )(x, w, b)


# -----------------------------------------------------------------------------
# Kernel 2: flash attention (online softmax), grid (B, H, Lq/tq, Lk/tk).
# Q is assumed pre-scaled by 1/sqrt(d_k) (folded into the Q projection).
# -----------------------------------------------------------------------------
def flash_attn_kernel(q_ref, k_ref, v_ref, o_ref, m_sc, l_sc, acc_sc):
    ki = pl.program_id(3)

    @pl.when(ki == 0)
    def _init():
        m_sc[...] = jnp.full_like(m_sc, -jnp.inf)
        l_sc[...] = jnp.zeros_like(l_sc)
        acc_sc[...] = jnp.zeros_like(acc_sc)

    q = q_ref[0, 0]                                           # (tq, dk)
    k = k_ref[0, 0]                                           # (tk, dk)
    v = v_ref[0, 0]                                           # (tk, dk)

    # scores = Q @ K^T (contract over dk, no explicit transpose), f32 accum.
    s = jax.lax.dot_general(q, k, (((1,), (1,)), ((), ())),
                            preferred_element_type=jnp.float32)   # (tq, tk)

    m_prev = m_sc[...]                                        # (tq, 1)
    m_new = jnp.maximum(m_prev, jnp.max(s, axis=-1, keepdims=True))
    alpha = jnp.exp(m_prev - m_new)                           # (tq, 1)
    p = jnp.exp(s - m_new)                                    # (tq, tk) f32

    l_sc[...] = alpha * l_sc[...] + jnp.sum(p, axis=-1, keepdims=True)
    m_sc[...] = m_new
    acc_sc[...] = alpha * acc_sc[...] + jnp.dot(
        p.astype(v.dtype), v, preferred_element_type=jnp.float32)

    @pl.when(ki == pl.num_programs(3) - 1)
    def _finalize():
        inv_l = pl.reciprocal(l_sc[...], approx=True)         # EUP, not VPU divide
        o_ref[0, 0] = (acc_sc[...] * inv_l).astype(o_ref.dtype)


def flash_attention(q, k, v, *, q_tile=256, k_tile=512):
    """q: (B, H, Lq, dk); k, v: (B, H, Lk, dk) -> (B, H, Lq, dk)."""
    B, H, Lq, dk = q.shape
    Lk = k.shape[2]
    tq = min(q_tile, Lq)
    tk = min(k_tile, Lk)
    assert Lq % tq == 0 and Lk % tk == 0, "Lq/Lk must be multiples of the tiles"

    itemsize = q.dtype.itemsize
    flops = int(4 * B * H * Lq * Lk * dk)
    transcendentals = int(B * H * Lq * Lk)
    bytes_accessed = int(itemsize * 2 * q.size
                         + (Lq // tq) * itemsize * (k.size + v.size))

    return pl.pallas_call(
        flash_attn_kernel,
        out_shape=jax.ShapeDtypeStruct((B, H, Lq, dk), q.dtype),
        grid_spec=pltpu.PrefetchScalarGridSpec(
            num_scalar_prefetch=0,
            grid=(B, H, Lq // tq, Lk // tk),
            in_specs=[pl.BlockSpec((1, 1, tq, dk), lambda b, h, qi, ki: (b, h, qi, 0)),
                      pl.BlockSpec((1, 1, tk, dk), lambda b, h, qi, ki: (b, h, ki, 0)),
                      pl.BlockSpec((1, 1, tk, dk), lambda b, h, qi, ki: (b, h, ki, 0))],
            out_specs=pl.BlockSpec((1, 1, tq, dk), lambda b, h, qi, ki: (b, h, qi, 0)),
            scratch_shapes=[pltpu.VMEM((tq, 1), jnp.float32),
                            pltpu.VMEM((tq, 1), jnp.float32),
                            pltpu.VMEM((tq, dk), jnp.float32)],
        ),
        compiler_params=pltpu.CompilerParams(
            dimension_semantics=("parallel", "parallel", "parallel", "arbitrary")),
        cost_estimate=pl.CostEstimate(flops=flops,
                                      transcendentals=transcendentals,
                                      bytes_accessed=bytes_accessed),
    )(q, k, v)


# -----------------------------------------------------------------------------
# Full forward pass (matches MultiHeadAttention.forward, eval mode, mask=None).
# -----------------------------------------------------------------------------
def mha_forward(query, key, value, params, *, nhead,
                q_tile=256, k_tile=512, row_tile=256):
    B, Lq, D = query.shape
    _, Lk, _ = key.shape
    assert D % nhead == 0
    d_k = D // nhead
    scale = 1.0 / float(d_k) ** 0.5

    w_qkv, b_qkv = params["w_qkv"], params["b_qkv"]
    w_o, b_o = params["w_o"], params["b_o"]

    if query is key and key is value:
        # Self-attention: read the activation once and project Q/K/V together.
        q, k, v = qkv_project(query, w_qkv, b_qkv, scale=scale, row_tile=row_tile)
    else:
        q = linear(query, w_qkv[0], b_qkv[0], scale=scale, row_tile=row_tile)
        k = linear(key, w_qkv[1], b_qkv[1], row_tile=row_tile)
        v = linear(value, w_qkv[2], b_qkv[2], row_tile=row_tile)

    # Head split / merge is layout plumbing outside the kernels.
    qh = q.reshape(B, Lq, nhead, d_k).transpose(0, 2, 1, 3)   # (B, H, Lq, dk)
    kh = k.reshape(B, Lk, nhead, d_k).transpose(0, 2, 1, 3)
    vh = v.reshape(B, Lk, nhead, d_k).transpose(0, 2, 1, 3)

    ctx = flash_attention(qh, kh, vh, q_tile=q_tile, k_tile=k_tile)
    ctx = ctx.transpose(0, 2, 1, 3).reshape(B, Lq, D)

    # Output projection: single full-depth matmul over concatenated heads.
    return linear(ctx, w_o, b_o, row_tile=row_tile)


def mha_reference(query, key, value, params, *, nhead):
    """Pure-JAX reference mirroring the PyTorch module (eval mode, mask=None)."""
    B, Lq, D = query.shape
    Lk = key.shape[1]
    d_k = D // nhead
    w_qkv, b_qkv, w_o, b_o = (params["w_qkv"], params["b_qkv"],
                              params["w_o"], params["b_o"])
    with jax.default_matmul_precision("highest"):
        q = query @ w_qkv[0] + b_qkv[0]
        k = key @ w_qkv[1] + b_qkv[1]
        v = value @ w_qkv[2] + b_qkv[2]
        qh = q.reshape(B, Lq, nhead, d_k).transpose(0, 2, 1, 3)
        kh = k.reshape(B, Lk, nhead, d_k).transpose(0, 2, 1, 3)
        vh = v.reshape(B, Lk, nhead, d_k).transpose(0, 2, 1, 3)
        s = jnp.einsum("bhqd,bhkd->bhqk", qh, kh) / jnp.sqrt(jnp.float32(d_k))
        p = jax.nn.softmax(s, axis=-1)
        ctx = jnp.einsum("bhqk,bhkd->bhqd", p, vh)
        ctx = ctx.transpose(0, 2, 1, 3).reshape(B, Lq, D)
        return ctx @ w_o + b_o


def init_params(key, d_model):
    """Weights stored (in_features, out_features) so kernel matmuls are x @ W."""
    ks = jax.random.split(key, 4)
    bound = 1.0 / (d_model ** 0.5)
    w_qkv = jax.random.uniform(ks[0], (3, d_model, d_model), jnp.float32,
                               -bound, bound)
    b_qkv = jax.random.uniform(ks[1], (3, 1, d_model), jnp.float32, -bound, bound)
    w_o = jax.random.uniform(ks[2], (d_model, d_model), jnp.float32, -bound, bound)
    b_o = jax.random.uniform(ks[3], (1, d_model), jnp.float32, -bound, bound)
    return dict(w_qkv=w_qkv, b_qkv=b_qkv, w_o=w_o, b_o=b_o)


if __name__ == "__main__":
    d_model, nhead = 32, 4
    batch, seq = 2, 8

    root = jax.random.PRNGKey(0)
    k_x, k_q, k_k, k_v, k_p = jax.random.split(root, 5)
    params = init_params(k_p, d_model)

    # 1) Self-attention path (fused QKV projection).
    x = jax.random.normal(k_x, (batch, seq, d_model), jnp.float32)
    out = mha_forward(x, x, x, params, nhead=nhead)
    jax.block_until_ready(out)
    assert out.shape == (batch, seq, d_model)
    ref = mha_reference(x, x, x, params, nhead=nhead)
    max_err = float(jnp.max(jnp.abs(out - ref)))
    assert max_err < 1e-2, f"self-attention mismatch vs reference: {max_err}"

    # 2) Cross-attention path (separate projections, Lk != Lq).
    seq_kv = 16
    q_in = jax.random.normal(k_q, (batch, seq, d_model), jnp.float32)
    k_in = jax.random.normal(k_k, (batch, seq_kv, d_model), jnp.float32)
    v_in = jax.random.normal(k_v, (batch, seq_kv, d_model), jnp.float32)
    out2 = mha_forward(q_in, k_in, v_in, params, nhead=nhead)
    jax.block_until_ready(out2)
    assert out2.shape == (batch, seq, d_model)
    ref2 = mha_reference(q_in, k_in, v_in, params, nhead=nhead)
    max_err2 = float(jnp.max(jnp.abs(out2 - ref2)))
    assert max_err2 < 1e-2, f"cross-attention mismatch vs reference: {max_err2}"

    print("KERNEL_OK")
</pallas_src>

<mosaic_0001>
module attributes {stable_mosaic.version = 11 : i64} {
  func.func @qkv_proj_kernel(%arg0: i32, %arg1: i32, %arg2: memref<1x8x32xf32, #tpu.memory_space<vmem>>, %arg3: memref<3x32x32xf32, #tpu.memory_space<vmem>>, %arg4: memref<3x1x32xf32, #tpu.memory_space<vmem>>, %arg5: memref<1x8x32xf32, #tpu.memory_space<vmem>>, %arg6: memref<1x8x32xf32, #tpu.memory_space<vmem>>, %arg7: memref<1x8x32xf32, #tpu.memory_space<vmem>>) attributes {dimension_semantics = [#tpu.dimension_semantics<parallel>, #tpu.dimension_semantics<parallel>], iteration_bounds = array<i64: 2, 1>, scalar_prefetch = 0 : i64, scratch_operands = 0 : i64, tpu.core_type = #tpu.core_type<tc>, window_params = [{transform_indices = @transform_0, window_bounds = array<i64: 1, 8, 32>}, {pipeline_mode = #tpu.pipeline_mode<synchronous>, transform_indices = @transform_1, window_bounds = array<i64: 3, 32, 32>}, {pipeline_mode = #tpu.pipeline_mode<synchronous>, transform_indices = @transform_2, window_bounds = array<i64: 3, 1, 32>}, {transform_indices = @transform_3, window_bounds = array<i64: 1, 8, 32>}, {transform_indices = @transform_4, window_bounds = array<i64: 1, 8, 32>}, {transform_indices = @transform_5, window_bounds = array<i64: 1, 8, 32>}]} {
    %c0 = arith.constant 0 : index
    %c0_0 = arith.constant 0 : index
    %c0_1 = arith.constant 0 : index
    %0 = vector.load %arg2[%c0, %c0_0, %c0_1] : memref<1x8x32xf32, #tpu.memory_space<vmem>>, vector<1x8x32xf32>
    %1 = vector.shape_cast %0 : vector<1x8x32xf32> to vector<8x32xf32>
    %c0_2 = arith.constant 0 : index
    %c0_3 = arith.constant 0 : index
    %c0_4 = arith.constant 0 : index
    %2 = vector.load %arg3[%c0_2, %c0_3, %c0_4] : memref<3x32x32xf32, #tpu.memory_space<vmem>>, vector<1x32x32xf32>
    %3 = vector.shape_cast %2 : vector<1x32x32xf32> to vector<32x32xf32>
    %cst = arith.constant dense<0.000000e+00> : vector<8x32xf32>
    %4 = tpu.matmul %1, %3, %cst {dimension_numbers = #tpu.dot_dimension_numbers<[1], [0], [0], [1], [0, 0, 1, 1], [], []>} : vector<8x32xf32>, vector<32x32xf32>, vector<8x32xf32> -> vector<8x32xf32>
    %c1 = arith.constant 1 : index
    %c0_5 = arith.constant 0 : index
    %c0_6 = arith.constant 0 : index
    %5 = vector.load %arg3[%c1, %c0_5, %c0_6] : memref<3x32x32xf32, #tpu.memory_space<vmem>>, vector<1x32x32xf32>
    %6 = vector.shape_cast %5 : vector<1x32x32xf32> to vector<32x32xf32>
    %cst_7 = arith.constant dense<0.000000e+00> : vector<8x32xf32>
    %7 = tpu.matmul %1, %6, %cst_7 {dimension_numbers = #tpu.dot_dimension_numbers<[1], [0], [0], [1], [0, 0, 1, 1], [], []>} : vector<8x32xf32>, vector<32x32xf32>, vector<8x32xf32> -> vector<8x32xf32>
    %c2 = arith.constant 2 : index
    %c0_8 = arith.constant 0 : index
    %c0_9 = arith.constant 0 : index
    %8 = vector.load %arg3[%c2, %c0_8, %c0_9] : memref<3x32x32xf32, #tpu.memory_space<vmem>>, vector<1x32x32xf32>
    %9 = vector.shape_cast %8 : vector<1x32x32xf32> to vector<32x32xf32>
    %cst_10 = arith.constant dense<0.000000e+00> : vector<8x32xf32>
    %10 = tpu.matmul %1, %9, %cst_10 {dimension_numbers = #tpu.dot_dimension_numbers<[1], [0], [0], [1], [0, 0, 1, 1], [], []>} : vector<8x32xf32>, vector<32x32xf32>, vector<8x32xf32> -> vector<8x32xf32>
    %c0_11 = arith.constant 0 : index
    %c0_12 = arith.constant 0 : index
    %c0_13 = arith.constant 0 : index
    %11 = vector.load %arg4[%c0_11, %c0_12, %c0_13] : memref<3x1x32xf32, #tpu.memory_space<vmem>>, vector<1x1x32xf32>
    %12 = vector.shape_cast %11 : vector<1x1x32xf32> to vector<1x32xf32>
    %13 = vector.broadcast %12 : vector<1x32xf32> to vector<8x32xf32>
    %14 = arith.addf %4, %13 : vector<8x32xf32>
    %cst_14 = arith.constant 0.353553385 : f32
    %15 = vector.broadcast %cst_14 : f32 to vector<8x32xf32>
    %16 = arith.mulf %14, %15 : vector<8x32xf32>
    %c1_15 = arith.constant 1 : index
    %c0_16 = arith.constant 0 : index
    %c0_17 = arith.constant 0 : index
    %17 = vector.load %arg4[%c1_15, %c0_16, %c0_17] : memref<3x1x32xf32, #tpu.memory_space<vmem>>, vector<1x1x32xf32>
    %18 = vector.shape_cast %17 : vector<1x1x32xf32> to vector<1x32xf32>
    %19 = vector.broadcast %18 : vector<1x32xf32> to vector<8x32xf32>
    %20 = arith.addf %7, %19 : vector<8x32xf32>
    %c2_18 = arith.constant 2 : index
    %c0_19 = arith.constant 0 : index
    %c0_20 = arith.constant 0 : index
    %21 = vector.load %arg4[%c2_18, %c0_19, %c0_20] : memref<3x1x32xf32, #tpu.memory_space<vmem>>, vector<1x1x32xf32>
    %22 = vector.shape_cast %21 : vector<1x1x32xf32> to vector<1x32xf32>
    %23 = vector.broadcast %22 : vector<1x32xf32> to vector<8x32xf32>
    %24 = arith.addf %10, %23 : vector<8x32xf32>
    %c0_21 = arith.constant 0 : index
    %c0_22 = arith.constant 0 : index
    %c0_23 = arith.constant 0 : index
    %25 = vector.load %arg5[%c0_21, %c0_22, %c0_23] : memref<1x8x32xf32, #tpu.memory_space<vmem>>, vector<1x8x32xf32>
    %26 = vector.shape_cast %25 : vector<1x8x32xf32> to vector<8x32xf32>
    %27 = vector.shape_cast %16 : vector<8x32xf32> to vector<1x8x32xf32>
    tpu.vector_store %arg5[%c0_21, %c0_22, %c0_23], %27 {strides = array<i32>} : memref<1x8x32xf32, #tpu.memory_space<vmem>>, vector<1x8x32xf32>,
    %c0_24 = arith.constant 0 : index
    %c0_25 = arith.constant 0 : index
    %c0_26 = arith.constant 0 : index
    %28 = vector.load %arg6[%c0_24, %c0_25, %c0_26] : memref<1x8x32xf32, #tpu.memory_space<vmem>>, vector<1x8x32xf32>
    %29 = vector.shape_cast %28 : vector<1x8x32xf32> to vector<8x32xf32>
    %30 = vector.shape_cast %20 : vector<8x32xf32> to vector<1x8x32xf32>
    tpu.vector_store %arg6[%c0_24, %c0_25, %c0_26], %30 {strides = array<i32>} : memref<1x8x32xf32, #tpu.memory_space<vmem>>, vector<1x8x32xf32>,
    %c0_27 = arith.constant 0 : index
    %c0_28 = arith.constant 0 : index
    %c0_29 = arith.constant 0 : index
    %31 = vector.load %arg7[%c0_27, %c0_28, %c0_29] : memref<1x8x32xf32, #tpu.memory_space<vmem>>, vector<1x8x32xf32>
    %32 = vector.shape_cast %31 : vector<1x8x32xf32> to vector<8x32xf32>
    %33 = vector.shape_cast %24 : vector<8x32xf32> to vector<1x8x32xf32>
    tpu.vector_store %arg7[%c0_27, %c0_28, %c0_29], %33 {strides = array<i32>} : memref<1x8x32xf32, #tpu.memory_space<vmem>>, vector<1x8x32xf32>,
    return
  }
  func.func @transform_0(%arg0: i32, %arg1: i32) -> (i32, i32, i32) {
    %c0_i32 = arith.constant 0 : i32
    %c0_i32_0 = arith.constant 0 : i32
    return %arg0, %arg1, %c0_i32 : i32, i32, i32
  }
  func.func @transform_1(%arg0: i32, %arg1: i32) -> (i32, i32, i32) {
    %c0_i32 = arith.constant 0 : i32
    %c0_i32_0 = arith.constant 0 : i32
    %c0_i32_1 = arith.constant 0 : i32
    %c0_i32_2 = arith.constant 0 : i32
    return %c0_i32, %c0_i32_0, %c0_i32_1 : i32, i32, i32
  }
  func.func @transform_2(%arg0: i32, %arg1: i32) -> (i32, i32, i32) {
    %c0_i32 = arith.constant 0 : i32
    %c0_i32_0 = arith.constant 0 : i32
    %c0_i32_1 = arith.constant 0 : i32
    %c0_i32_2 = arith.constant 0 : i32
    return %c0_i32, %c0_i32_0, %c0_i32_1 : i32, i32, i32
  }
  func.func @transform_3(%arg0: i32, %arg1: i32) -> (i32, i32, i32) {
    %c0_i32 = arith.constant 0 : i32
    %c0_i32_0 = arith.constant 0 : i32
    return %arg0, %arg1, %c0_i32 : i32, i32, i32
  }
  func.func @transform_4(%arg0: i32, %arg1: i32) -> (i32, i32, i32) {
    %c0_i32 = arith.constant 0 : i32
    %c0_i32_0 = arith.constant 0 : i32
    return %arg0, %arg1, %c0_i32 : i32, i32, i32
  }
  func.func @transform_5(%arg0: i32, %arg1: i32) -> (i32, i32, i32) {
    %c0_i32 = arith.constant 0 : i32
    %c0_i32_0 = arith.constant 0 : i32
    return %arg0, %arg1, %c0_i32 : i32, i32, i32
  }
}

</mosaic_0001>

<bundles_post_ra>
// kernel: tpu_custom_call.1
= control target key start
LH: loop header
LB: loop body
LE: loop exit
PB: predicated region body
PF: predicated region fallthrough
CT: control target
= control target key end

     0   :  { %s1259_s0 = inlined_call_operand.hbm [shape: f32[2,8,32], index: 0, kind: input, shape index: {}]   ;;  %s1260_s1 = inlined_call_operand.hbm [shape: f32[3,32,32], index: 1, kind: input, shape index: {}]   ;;  %s1261_s2 = inlined_call_operand.hbm [shape: f32[3,1,32], index: 2, kind: input, shape index: {}]   ;;  %s1262_s3 = inlined_call_operand.hbm [shape: f32[2,8,32], index: 3, kind: output, shape index: {0}]   ;;  %s1263_s4 = inlined_call_operand.hbm [shape: f32[2,8,32], index: 4, kind: output, shape index: {1}]   ;;  %s1264_s5 = inlined_call_operand.hbm [shape: f32[2,8,32], index: 5, kind: output, shape index: {2}]  }
   0x1   :  { %1269 = sst [smem:[#allocation17_spill]] %s1259_s0 }
   0x2   :  { %11 = vsyncpa [#allocation3], 0 }
   0x3   :  { %13 = vsyncpa [#allocation3 + $0x1], 0 }
   0x4   :  { %14 = vsyncpa [#allocation6], 0 }
   0x5   :  { %15 = vsyncpa [#allocation4], 0 }
   0x6   :  { %17 = vsyncpa [#allocation4 + $0x1], 0 }
   0x7   :  { %18 = vsyncpa [#allocation10], 0 }
   0x8   :  { %20 = vsyncpa [#allocation10 + $0x1], 0  ;;  %s1032_s18 = smov 0   ;;  %s1034_s19 = smov 0  }
   0x9   :  { %s1036_s20 = smov 0   ;;  %s1038_s21 = smov 0  }
   0xa   :  { %s1040_s22 = smov 0   ;;  %s1042_s23 = smov 0  }
   0xb LB: > { %s1063_s24 = sadd.s32 4294967295, %s994_s23   ;;  %p634_p0 = scmp.ge.s32.totalorder %s994_s23, 1  ;;  %s994_s23 = sphi %s1042_s23, %s26_s23   ;;  %s990_s22 = sphi %s1040_s22, %s1285_s22   ;;  %s986_s21 = sphi %s1038_s21, %s1284_s21   ;;  %s982_s20 = sphi %s1036_s20, %s1283_s20   ;;  %s978_s19 = sphi %s1034_s19, %s1282_s19   ;;  %s974_s18 = sphi %s1032_s18, %s1281_s18  }
   0xc   : > { %p61_p1 = scmp.eq.s32.totalorder %s1063_s24, 0  ;;  %p197_p2 = scmp.lt.s32.totalorder %s994_s23, 3 }
   0xd   : > { %s208_s27 = sshll.u32 %s1260_s1, 4  ;;  %s996_s29 = smov [#allocation5]   ;;  %s209_s27 = int_to_ptr.hbm [resolvable:$true] %s208_s27 }
   0xe   : > { %p1071_p3 = pnand %p634_p0, %p197_p2  ;;  %s210_s30 = sshll.u32 %s996_s29, 4  ;;  %s211_s30 = int_to_ptr.vmem [resolvable:$true] %s210_s30 }
   0xf   : > { %p637_p6 = scmp.ge.s32.totalorder %s994_s23, 2  ;;  %s222_s8 = sshll.u32 %s1261_s2, 4  ;;  %s223_s8 = int_to_ptr.hbm [resolvable:$true] %s222_s8 }
  0x10   : > { %p674_p4 = pneg %p1071_p3  ;;  %s997_s9 = smov 128  }
  0x11   : > { %s998_s10 = smov 8   ;;  %s999_s11 = smov [#allocation7]  }
  0x12   : > { %p675_p5 = pnand %p674_p4, %p61_p1  ;;  %s224_s12 = sshll.u32 %s999_s11, 4  ;;  %s225_s12 = int_to_ptr.vmem [resolvable:$true] %s224_s12 }
  0x13   : > { %s1000_s13 = smov 16   ;;  %s1001_s14 = smov 1  }
  0x14   : > { %677 = dma.hbm_to_vmem [thread:$0]  (!%p675_p5), %s209_s27, 1536, %s211_s30, [#allocation6], %s997_s9, %s997_s9, %s998_s10  }
  0x15   : > { %680 = dma.hbm_to_vmem [thread:$0]  (!%p675_p5), %s223_s8, 48, %s225_s12, [#allocation6], %s1000_s13, %s1000_s13, %s1001_s14  }
  0x16   : > { %s38_s15 = sadd.s32 1, %s990_s22  ;;  %s1265_s16 = sadd.s32 4294967294, %s994_s23  }
  0x17   : > { %p40_p7 = scmp.ge.s32.totalorder %s38_s15, 2  ;;  %s47_s17 = sadd.s32 1, %s982_s20 }
  0x18   : > { %p54_p8 = scmp.ne.s32.totalorder %s982_s20, %s978_s19  ;;  %p55_p9 = scmp.eq.s32.totalorder %s994_s23, 0 }
  0x19   : > { %s1287_s15 = smov (%p40_p7, %s38_s15), 0  ;;  %p60_p10 = scmp.ne.s32.totalorder %s978_s19, %s974_s18 }
  0x1a   : > { %s42_s25 = ssub.s32 %s990_s22, %s1287_s15  ;;  %p128_p11 = scmp.eq.s32.totalorder %s1063_s24, 1 }
  0x1b   : > { %p45_p12 = scmp.eq.s32.totalorder %s42_s25, 0  ;;  %p1098_p13 = por %p61_p1, %p60_p10 }
  0x1c   : > { %p1102_p0 = por %p128_p11, %p54_p8  ;;  %p134_p2 = scmp.eq.s32.totalorder %s1265_s16, 1 }
  0x1d   : > { %s1109_s29 = scalar_select %p45_p12, %s982_s20, %s47_s17  }
  0x1e   : > { %p56_p4 = por %p55_p9, %p54_p8  ;;  %p1111_p5 = por %p134_p2, %p60_p10 }
  0x1f   : > { %s238_s6 = sand.u32 1, %s982_s20   ;;  %s639_s7 = sshll.u32 %s990_s22, 3 }
  0x20   : > { %p697_p7 = scmp.lt.s32.totalorder %s994_s23, 2  ;;  %s638_s8 = sshll.u32 %s238_s6, 3 }
  0x21   : > { %s1274_s0 = sld [smem:[#allocation17_spill]]  ;;  %s242_s13 = scalar_lea.vmem [#allocation2], %s638_s8 }
  0x22   : > { %s251_s14 = sshll.u32 %s242_s13, 4  ;;  %p682_p11 = pnand %p697_p7, %p56_p4  ;;  %s252_s14 = int_to_ptr.vmem [resolvable:$true] %s251_s14 }
  0x23   : > { %s239_s17 = scalar_lea.sflag [#allocation3], %s238_s6 }
  0x25   : > { %260 = sbr.rel (%p1071_p3) target bundleno = 216 (0xd8), region = 32 }
  0x27   : > { %s247_s11 = scalar_lea.hbm %s1274_s0, %s639_s7 }
  0x28   : > { %s249_s12 = sshll.u32 %s247_s11, 4  ;;  %s250_s12 = int_to_ptr.hbm [resolvable:$true] %s249_s12 }
  0x29   : > { %684 = dma.hbm_to_vmem [thread:$0]  (!%p682_p11), %s250_s12, 128, %s252_s14, %s239_s17  }
  0x2a   : > { %s1124_s25 = sand.u32 1, %s978_s19  }
  0x2b   : > { %s1127_s16 = sshll.u32 %s1124_s25, 3  ;;  %s263_s7 = scalar_lea.sflag [#allocation3], %s1124_s25 }
  0x2c   : > { %s266_s8 = scalar_lea.vmem [#allocation2], %s1127_s16 }
  0x2d   : > { %957 = dma.done.wait (%p1098_p13), %s263_s7, 128  }
  0x2e   : > { %959 = vsyncadd (%p1098_p13), %s263_s7, 4294967168 }
  0x2f   : > { %961 = dma.done.wait (%p61_p1), [#allocation6], 1584  }
  0x30   : > { %963 = vsyncadd (%p61_p1), [#allocation6], 4294965712  ;;  %v328_v0 = vld [vmem:[#allocation5 + $0x58] sm:$0xff]  ;;  %v327_v1 = vld [vmem:[#allocation5 + $0x50] sm:$0xff]  ;;  %vm333_vm0 = vcmask 261120   ;;  %s653_s28 = sshll.u32 %s986_s21, 3 }
  0x31   : > { %v318_v2 = vld [vmem:[#allocation5 + $0x18] sm:$0xff]  ;;  %400 = vmatpush.msra.mxu2 %v328_v0  ;;  %v317_v4 = vld [vmem:[#allocation5 + $0x10] sm:$0xff]  ;;  %v326_v5 = vld [vmem:[#allocation5 + $0x48] sm:$0xff]  ;;  %s416_s26 = sand.u32 1, %s1063_s24   ;;  %s448_s10 = scalar_lea.hbm %s1263_s4, %s653_s28 }
  0x32   : > { %349 = vmatpush.msra.mxu0 %v318_v2  ;;  %v323_v3 = vld [vmem:[#allocation5 + $0x38] sm:$0xff]  ;;  %v322_v6 = vld [vmem:[#allocation5 + $0x30] sm:$0xff]  ;;  %v316_v7 = vld [vmem:[#allocation5 + $0x8] sm:$0xff]  ;;  %s306_s11 = scalar_lea.vmem [#allocation9], %s1127_s16  ;;  %s433_s17 = scalar_lea.hbm %s1262_s3, %s653_s28 }
  0x33   : > { %375 = vmatpush.msra.mxu1 %v323_v3  ;;  %401 = vmatpush.msra.mxu2 %v327_v1  ;;  %v321_v8 = vld [vmem:[#allocation5 + $0x28] sm:$0xff]  ;;  %v325_v9 = vld [vmem:[#allocation5 + $0x40] sm:$0xff]  ;;  %v314_v11 = vld [vmem:[%s266_s8] sm:$0xff]  ;;  %s1148_s12 = sshll.u32 %s306_s11, 4  ;;  %s463_s21 = scalar_lea.hbm %s1264_s5, %s653_s28  ;;  %s451_s12 = int_to_ptr.vmem [resolvable:$true] %s1148_s12 }
  0x34   : > { %350 = vmatpush.msra.mxu0 %v317_v4  ;;  %v315_v10 = vld [vmem:[#allocation5] sm:$0xff]  ;;  %s1157_s24 = sshll.u32 %s448_s10, 4  ;;  %s1268_s6 = scalar_lea.vmem [#allocation8], %s1127_s16  ;;  %s453_s24 = int_to_ptr.hbm [resolvable:$true] %s1157_s24 }
  0x35   : > { %376 = vmatpush.msra.mxu1 %v322_v6  ;;  %402 = vmatpush.msra.mxu2 %v326_v5  ;;  %v320_v12 = vld [vmem:[#allocation5 + $0x20] sm:$0xff]  ;;  %s1162_s9 = sshll.u32 %s1268_s6, 4  ;;  %s1164_s0 = sshll.u32 %s433_s17, 4  ;;  %s438_s0 = int_to_ptr.hbm [resolvable:$true] %s1164_s0 }
  0x36   : > { %351 = vmatpush.msra.mxu0 %v316_v7  ;;  %v755_v13 = vld [vmem:[#allocation7] ss:$0 sm:$0xff]  ;;  %v756_v14 = vld [vmem:[#allocation7 + $0x1] ss:$0 sm:$0xff]  ;;  %1275 = sst [smem:[#allocation16_spill]] %s1162_s9  ;;  %s1266_s13 = scalar_lea.vmem [#allocation11], %s1127_s16 }
  0x37   : > { %377 = vmatpush.msra.mxu1 %v321_v8  ;;  %403 = vmatpush.msra.mxu2 %v325_v9  ;;  %s1169_s14 = sshll.u32 %s1266_s13, 4  ;;  %s1171_s28 = sshll.u32 %s463_s21, 4  ;;  %v757_v20 = vld [vmem:[#allocation7 + $0x2] ss:$0 sm:$0xff]  ;;  %s466_s14 = int_to_ptr.vmem [resolvable:$true] %s1169_s14  ;;  %s468_s28 = int_to_ptr.hbm [resolvable:$true] %s1171_s28 }
  0x38   : > { %352 = vmatpush.msra.mxu0 %v315_v10  ;;  %649 = vmatmul.msk.f32.vlgmr.msra.gmra.mxu2 %vm333_vm0, %v314_v11  ;;  %s1179_s10 = scalar_lea.sflag [#allocation10], %s416_s26  ;;  %s862_s17 = sshra.s32 %s453_s24, 4  ;;  %s863_s17 = int_to_ptr.hbm [resolvable:$true] %s862_s17 }
  0x39   : > { %647 = vmatmul.msk.f32.vlgmr.msra.gmra.mxu0 %vm333_vm0, %v314_v11  ;;  %378 = vmatpush.msra.mxu1 %v320_v12  ;;  %s864_s7 = scalar_lea.hbm %s863_s17, 8  ;;  %s868_s13 = scalar_lea.hbm %s1263_s4, 16 }
  0x3a   : > { %648 = vmatmul.msk.f32.vlgmr.msra.gmra.mxu1 %vm333_vm0, %v314_v11  ;;  %p865_p1 = scmp.ne.s32.totalorder %s863_s17, %s864_s7  ;;  %p869_p9 = scmp.lt.s32.totalorder %s863_s17, %s1263_s4 }
  0x3b   : > { %p870_p10 = scmp.lt.s32.totalorder %s868_s13, %s864_s7 }
  0x3c   : > { %p866_p3 = pnand %p865_p1, %p1102_p0 }
  0x3d   : > { %p871_p12 = por %p870_p10, %p869_p9 }
  0x3e   : > { %p867_p8 = pneg %p866_p3 }
  0x40   : > { %p872_p13 = pnand %p871_p12, %p867_p8 }
  0xb6   : > { %v354_v15 = vpop.f32.mrf.mxu0 }
  0xb7   : > { %v355_v16 = vadd.f32 %v755_v13, %v354_v15  ;;  %v380_v17 = vpop.f32.mrf.mxu1 }
  0xb8   : > { %v381_v19 = vadd.f32 %v756_v14, %v380_v17 }
  0xb9   : > { %v357_v18 = vmul.f32 0.35355338, %v355_v16 }
  0xba   : > { %409 = vst.msk [vmem:[%s306_s11] sm:$0xff] %vm333_vm0, %v381_v19 }
  0xbb   : > { %v405_v21 = vpop.f32.mrf.mxu2 }
  0xbc   : > { %875 = shalt.err (!%p872_p13)
}
  0xbd   : > { %669 = dma.vmem_to_hbm [thread:$0]  (%p1102_p0), %s451_s12, 128, %s453_s24, %s1179_s10   ;;  %v406_v22 = vadd.f32 %v757_v20, %v405_v21 }
  0xbe   : > { %s1276_s26 = scalar_lea.vmem [#allocation8], %s1127_s16  ;;  %s412_s11 = scalar_lea.sflag [#allocation4], %s1124_s25 }
  0xbf   : > { %408 = vst.msk [vmem:[%s1276_s26] sm:$0xff] %vm333_vm0, %v357_v18  ;;  %s890_s6 = sshra.s32 %s438_s0, 4  ;;  %s896_s7 = scalar_lea.hbm %s1262_s3, 16  ;;  %s891_s6 = int_to_ptr.hbm [resolvable:$true] %s890_s6 }
  0xc0   : > { %s892_s9 = scalar_lea.hbm %s891_s6, 8  ;;  %p897_p11 = scmp.lt.s32.totalorder %s891_s6, %s1262_s3 }
  0xc1   : > { %p893_p2 = scmp.ne.s32.totalorder %s891_s6, %s892_s9  ;;  %p898_p1 = scmp.lt.s32.totalorder %s896_s7, %s892_s9 }
  0xc3   : > { %p894_p4 = pnand %p893_p2, %p1102_p0  ;;  %p899_p3 = por %p898_p1, %p897_p11 }
  0xc5   : > { %p895_p7 = pneg %p894_p4 }
  0xc7   : > { %p900_p8 = pnand %p899_p3, %p895_p7 }
  0xc9   : > { %903 = shalt.err (!%p900_p8)
}
  0xca   : > { %s1277_s25 = sld [smem:[#allocation16_spill]]  ;;  %s1279_s24 = scalar_lea.vmem [#allocation11], %s1127_s16 }
  0xcb   : > { %410 = vst.msk [vmem:[%s1279_s24] sm:$0xff] %vm333_vm0, %v406_v22  ;;  %s918_s26 = sshra.s32 %s468_s28, 4  ;;  %s924_s17 = scalar_lea.hbm %s1264_s5, 16  ;;  %s919_s26 = int_to_ptr.hbm [resolvable:$true] %s918_s26 }
  0xcc   : > { %s920_s6 = scalar_lea.hbm %s919_s26, 8  ;;  %p925_p13 = scmp.lt.s32.totalorder %s919_s26, %s1264_s5 }
  0xcd   : > { %p921_p9 = scmp.ne.s32.totalorder %s919_s26, %s920_s6  ;;  %p926_p2 = scmp.lt.s32.totalorder %s924_s17, %s920_s6 }
  0xcf   : > { %p922_p10 = pnand %p921_p9, %p1102_p0  ;;  %p927_p4 = por %p926_p2, %p925_p13 }
  0xd0   : > { %s1278_s12 = int_to_ptr.vmem [resolvable:$true] %s1277_s25 }
  0xd1   : > { %668 = dma.vmem_to_hbm [thread:$0]  (%p1102_p0), %s1278_s12, 128, %s438_s0, %s412_s11  }
  0xd2   : > { %p923_p12 = pneg %p922_p10 }
  0xd4   : > { %p928_p7 = pnand %p927_p4, %p923_p12 }
  0xd6   : > { %931 = shalt.err (!%p928_p7)
}
  0xd7   : > { %670 = dma.vmem_to_hbm [thread:$0]  (%p1102_p0), %s466_s14, 128, %s468_s28, %s1179_s10  }
  0xd8 PF: > { %s479_s0 = sand.u32 1, %s974_s18   ;;  %p686_p11 = pnand %p637_p6, %p1111_p5 }
  0xd9   : > { %s480_s16 = scalar_lea.sflag [#allocation4], %s479_s0 }
  0xda   : > { %p687_p1 = pneg %p686_p11 }
  0xdc   : > { %965 = dma.done.wait (%p687_p1), %s480_s16, 128  }
  0xdd   : > { %967 = vsyncadd (%p687_p1), %s480_s16, 4294967168  ;;  %s1280_s27 = sadd.s32 4294967294, %s994_s23  }
  0xde   : > { %s489_s11 = sand.u32 1, %s1280_s27  }
  0xdf   : > { %s490_s21 = scalar_lea.sflag [#allocation10], %s489_s11 }
  0xe0   : > { %969 = dma.done.wait (%p687_p1), %s490_s21, 256  }
  0xe1   : > { %971 = vsyncadd (%p687_p1), %s490_s21, 4294967040  ;;  %s26_s23 = sadd.s32 1, %s994_s23   ;;  %s1281_s18 = smov %s978_s19 }
  0xe2   : > { %p23_p0 = scmp.ge.s32.totalorder %s26_s23, 4   ;;  %s1282_s19 = smov %s982_s20 }
  0xe3   : > { %s1283_s20 = smov %s1109_s29  ;;  %s1284_s21 = smov %s990_s22 }
  0xe4   : > { %s1285_s22 = smov %s1287_s15  ;;  %25 = sbr.rel (!%p23_p0) target bundleno = 11 (0xb), region = 121 }
  0xe9   :  { %506 = vsyncpa [#allocation3], 1 }
  0xea   :  { %508 = vsyncpa [#allocation3 + $0x1], 1 }
  0xeb   :  { %509 = vsyncpa [#allocation6], 1 }
  0xec   :  { %510 = vsyncpa [#allocation4], 1 }
  0xed   :  { %512 = vsyncpa [#allocation4 + $0x1], 1 }
  0xee   :  { %513 = vsyncpa [#allocation10], 1 }
  0xef   :  { %515 = vsyncpa [#allocation10 + $0x1], 1 }

</bundles_post_ra>
